<compile_context>
chip_gen: v7x
topology: tpu7x:2x2x1
jax: 0.10.0
libtpu: 0.0.40
codegen_flags: <defaults>
</compile_context>

<pallas_src>
import functools

import numpy as np
import jax
import jax.numpy as jnp
from jax import lax
from jax.experimental import pallas as pl
from jax.experimental.pallas import tpu as pltpu

_LN_EPS = 1e-5  # PyTorch nn.LayerNorm default (the spec module uses the default).


def _round_up(n, m):
    return ((n + m - 1) // m) * m


def _ffn_kernel(x_ref, w1_ref, b1_ref, w2_ref, b2_ref, g_ref, beta_ref, o_ref, *, eps):
    # x_ref:  (TM, Din) f32      w1_ref: (Din, Dh) bf16   b1_ref: (1, Dh) f32
    # w2_ref: (Dh, Din) bf16     b2_ref: (1, Din) f32     g_ref/beta_ref: (1, Din) f32
    x = x_ref[...]                      # f32, kept for the residual path
    xb = x.astype(jnp.bfloat16)         # bf16 MXU operand

    # position-wise linear 1 (Conv1d k=1) + ReLU; f32 accumulation on the MXU.
    h = jnp.dot(xb, w1_ref[...], preferred_element_type=jnp.float32) + b1_ref[...]
    h = jnp.maximum(h, 0.0)

    # position-wise linear 2 (Conv1d k=1) + residual (residual stays f32).
    y = jnp.dot(h.astype(jnp.bfloat16), w2_ref[...],
                preferred_element_type=jnp.float32) + b2_ref[...]
    y = y + x

    # LayerNorm over the feature dim (biased variance, matches PyTorch), f32 math.
    mean = jnp.mean(y, axis=-1, keepdims=True)
    yc = y - mean
    var = jnp.mean(yc * yc, axis=-1, keepdims=True)
    inv = lax.rsqrt(var + eps)          # EUP
    o_ref[...] = ((yc * inv) * g_ref[...] + beta_ref[...]).astype(o_ref.dtype)


def prepare_ffn_params(w1, b1, w2, b2, gamma, beta):
    """One-time layout/dtype plumbing — call once per parameter set, not per step.

    w1: (Dh, Din), b1: (Dh,)   Conv1d(d_in, d_hid, 1) weights (kernel dim squeezed)
    w2: (Din, Dh), b2: (Din,)
    gamma/beta: (Din,)         LayerNorm affine
    """
    Dh, Din = w1.shape
    return dict(
        w1t=jnp.asarray(w1).T.astype(jnp.bfloat16),          # (Din, Dh)
        b1=jnp.asarray(b1, jnp.float32).reshape(1, Dh),
        w2t=jnp.asarray(w2).T.astype(jnp.bfloat16),           # (Dh, Din)
        b2=jnp.asarray(b2, jnp.float32).reshape(1, Din),
        gamma=jnp.asarray(gamma, jnp.float32).reshape(1, Din),
        beta=jnp.asarray(beta, jnp.float32).reshape(1, Din),
    )


def position_wise_feed_forward(x, params, *, tm=1024, eps=_LN_EPS, out_dtype=None):
    """x: (B, L, Din) -> (B, L, Din).  `params` from prepare_ffn_params()."""
    B, L, Din = x.shape
    Dh = params["w1t"].shape[1]
    out_dtype = x.dtype if out_dtype is None else out_dtype
    # (out_dtype=jnp.bfloat16 halves output HBM traffic if the surrounding model permits.)

    # Fold batch + sequence into one M dimension for the MXU; no pad/slice copies.
    N = B * L
    x2 = x.reshape(N, Din)

    TM = min(tm, _round_up(N, 8))       # sublane-aligned row tile
    grid = (pl.cdiv(N, TM),)            # ragged tail handled by boundary masking

    def invariant(shape):
        # Loop-invariant operand: constant index_map, single VMEM buffer.
        return pl.BlockSpec(shape, lambda i: (0,) * len(shape),
                            pipeline_mode=pl.Buffered(1))

    # VMEM budget: 2x(x in) + 2x(out) double-buffered blocks, single-buffered bf16
    # weights, plus the f32 (TM, Dh) hidden slab and headroom. Capped at 64 MiB so
    # the same setting is valid on v7x.
    itemsize_in = x2.dtype.itemsize
    itemsize_out = jnp.dtype(out_dtype).itemsize
    block_bytes = (2 * TM * Din * itemsize_in
                   + 2 * TM * Din * itemsize_out
                   + 2 * Din * Dh * 2          # bf16 W1^T + W2^T
                   + TM * Dh * 4               # f32 hidden intermediate
                   + 4 * TM * Din * 4)         # residual / LN temporaries headroom
    vmem_limit = max(32 * 1024 * 1024, min(64 * 1024 * 1024, int(1.5 * block_bytes)))

    cost = pl.CostEstimate(
        flops=4 * N * Din * Dh,                                  # two matmuls
        transcendentals=N,                                       # rsqrt per row
        bytes_accessed=N * Din * (itemsize_in + itemsize_out)
                       + 2 * Din * Dh * 2 + (Dh + 3 * Din) * 4,
    )

    out = pl.pallas_call(
        functools.partial(_ffn_kernel, eps=eps),
        out_shape=jax.ShapeDtypeStruct((N, Din), out_dtype),
        grid_spec=pltpu.PrefetchScalarGridSpec(
            num_scalar_prefetch=0,
            grid=grid,
            in_specs=[
                pl.BlockSpec((TM, Din), lambda i: (i, 0)),   # x rows (pipelined)
                invariant((Din, Dh)),                         # W1^T (bf16)
                invariant((1, Dh)),                           # b1
                invariant((Dh, Din)),                         # W2^T (bf16)
                invariant((1, Din)),                          # b2
                invariant((1, Din)),                          # gamma
                invariant((1, Din)),                          # beta
            ],
            out_specs=pl.BlockSpec((TM, Din), lambda i: (i, 0)),
        ),
        compiler_params=pltpu.CompilerParams(
            dimension_semantics=("parallel",),
            vmem_limit_bytes=vmem_limit,
        ),
        cost_estimate=cost,
    )(x2, params["w1t"], params["b1"], params["w2t"], params["b2"],
      params["gamma"], params["beta"])

    return out.reshape(B, L, Din)


def reference(x, w1, b1, w2, b2, gamma, beta, eps=_LN_EPS):
    # Mirrors the kernel's dtype policy: bf16 matmul operands, f32 accumulation,
    # f32 residual + LayerNorm.
    xb = x.astype(jnp.bfloat16)
    h = jnp.einsum("bld,hd->blh", xb, w1.astype(jnp.bfloat16),
                   preferred_element_type=jnp.float32) + b1
    h = jnp.maximum(h, 0.0)
    y = jnp.einsum("blh,dh->bld", h.astype(jnp.bfloat16), w2.astype(jnp.bfloat16),
                   preferred_element_type=jnp.float32) + b2 + x
    mean = jnp.mean(y, axis=-1, keepdims=True)
    var = jnp.mean((y - mean) ** 2, axis=-1, keepdims=True)
    return (y - mean) * lax.rsqrt(var + eps) * gamma + beta


if __name__ == "__main__":
    B, L = 2, 8
    d_in, d_hid = 128, 256   # lane-dense feature dims (multiples of 128)

    key = jax.random.PRNGKey(0)
    kx, kw1, kb1, kw2, kb2 = jax.random.split(key, 5)

    x = jax.random.normal(kx, (B, L, d_in), dtype=jnp.float32)

    # Conv1d(k=1) parameters, squeezed to linear form.
    w1 = jax.random.normal(kw1, (d_hid, d_in), dtype=jnp.float32) * np.sqrt(1.0 / d_in)
    b1 = jax.random.normal(kb1, (d_hid,), dtype=jnp.float32) * 0.01
    w2 = jax.random.normal(kw2, (d_in, d_hid), dtype=jnp.float32) * np.sqrt(1.0 / d_hid)
    b2 = jax.random.normal(kb2, (d_in,), dtype=jnp.float32) * 0.01

    # LayerNorm affine params (PyTorch default init: ones / zeros).
    gamma = jnp.ones((d_in,), dtype=jnp.float32)
    beta = jnp.zeros((d_in,), dtype=jnp.float32)

    params = prepare_ffn_params(w1, b1, w2, b2, gamma, beta)   # one-time, off hot path

    out = position_wise_feed_forward(x, params)
    out = jax.block_until_ready(out)

    ref = reference(x, w1, b1, w2, b2, gamma, beta)
    np.testing.assert_allclose(np.asarray(out), np.asarray(ref), rtol=5e-3, atol=5e-3)

    print("KERNEL_OK")
</pallas_src>

<mosaic_0001>
module attributes {stable_mosaic.version = 11 : i64} {
  func.func @_ffn_kernel(%arg0: i32, %arg1: memref<16x128xf32, #tpu.memory_space<vmem>>, %arg2: memref<128x256xbf16, #tpu.memory_space<vmem>>, %arg3: memref<1x256xf32, #tpu.memory_space<vmem>>, %arg4: memref<256x128xbf16, #tpu.memory_space<vmem>>, %arg5: memref<1x128xf32, #tpu.memory_space<vmem>>, %arg6: memref<1x128xf32, #tpu.memory_space<vmem>>, %arg7: memref<1x128xf32, #tpu.memory_space<vmem>>, %arg8: memref<16x128xf32, #tpu.memory_space<vmem>>) attributes {dimension_semantics = [#tpu.dimension_semantics<parallel>], iteration_bounds = array<i64: 1>, scalar_prefetch = 0 : i64, scratch_operands = 0 : i64, tpu.core_type = #tpu.core_type<tc>, window_params = [{transform_indices = @transform_0, window_bounds = array<i64: 16, 128>}, {pipeline_mode = #tpu.pipeline_mode<synchronous>, transform_indices = @transform_1, window_bounds = array<i64: 128, 256>}, {pipeline_mode = #tpu.pipeline_mode<synchronous>, transform_indices = @transform_2, window_bounds = array<i64: 1, 256>}, {pipeline_mode = #tpu.pipeline_mode<synchronous>, transform_indices = @transform_3, window_bounds = array<i64: 256, 128>}, {pipeline_mode = #tpu.pipeline_mode<synchronous>, transform_indices = @transform_4, window_bounds = array<i64: 1, 128>}, {pipeline_mode = #tpu.pipeline_mode<synchronous>, transform_indices = @transform_5, window_bounds = array<i64: 1, 128>}, {pipeline_mode = #tpu.pipeline_mode<synchronous>, transform_indices = @transform_6, window_bounds = array<i64: 1, 128>}, {transform_indices = @transform_7, window_bounds = array<i64: 16, 128>}]} {
    %c0 = arith.constant 0 : index
    %c0_0 = arith.constant 0 : index
    %0 = vector.load %arg1[%c0, %c0_0] : memref<16x128xf32, #tpu.memory_space<vmem>>, vector<16x128xf32>
    %1 = arith.truncf %0 : vector<16x128xf32> to vector<16x128xbf16>
    %c0_1 = arith.constant 0 : index
    %c0_2 = arith.constant 0 : index
    %2 = vector.load %arg2[%c0_1, %c0_2] : memref<128x256xbf16, #tpu.memory_space<vmem>>, vector<128x256xbf16>
    %cst = arith.constant dense<0.000000e+00> : vector<16x256xf32>
    %3 = tpu.matmul %1, %2, %cst {dimension_numbers = #tpu.dot_dimension_numbers<[1], [0], [0], [1], [0, 0, 1, 1], [], []>} : vector<16x128xbf16>, vector<128x256xbf16>, vector<16x256xf32> -> vector<16x256xf32>
    %c0_3 = arith.constant 0 : index
    %c0_4 = arith.constant 0 : index
    %4 = vector.load %arg3[%c0_3, %c0_4] : memref<1x256xf32, #tpu.memory_space<vmem>>, vector<1x256xf32>
    %5 = vector.broadcast %4 : vector<1x256xf32> to vector<16x256xf32>
    %6 = arith.addf %3, %5 : vector<16x256xf32>
    %cst_5 = arith.constant 0.000000e+00 : f32
    %7 = vector.broadcast %cst_5 : f32 to vector<16x256xf32>
    %8 = arith.maximumf %6, %7 : vector<16x256xf32>
    %9 = arith.truncf %8 : vector<16x256xf32> to vector<16x256xbf16>
    %c0_6 = arith.constant 0 : index
    %c0_7 = arith.constant 0 : index
    %10 = vector.load %arg4[%c0_6, %c0_7] : memref<256x128xbf16, #tpu.memory_space<vmem>>, vector<256x128xbf16>
    %cst_8 = arith.constant dense<0.000000e+00> : vector<16x128xf32>
    %11 = tpu.matmul %9, %10, %cst_8 {dimension_numbers = #tpu.dot_dimension_numbers<[1], [0], [0], [1], [0, 0, 1, 1], [], []>} : vector<16x256xbf16>, vector<256x128xbf16>, vector<16x128xf32> -> vector<16x128xf32>
    %c0_9 = arith.constant 0 : index
    %c0_10 = arith.constant 0 : index
    %12 = vector.load %arg5[%c0_9, %c0_10] : memref<1x128xf32, #tpu.memory_space<vmem>>, vector<1x128xf32>
    %13 = vector.broadcast %12 : vector<1x128xf32> to vector<16x128xf32>
    %14 = arith.addf %11, %13 : vector<16x128xf32>
    %15 = arith.addf %14, %0 : vector<16x128xf32>
    %cst_11 = arith.constant dense<0.000000e+00> : vector<16xf32>
    %16 = vector.multi_reduction <add>, %15, %cst_11 [1] : vector<16x128xf32> to vector<16xf32>
    %17 = vector.shape_cast %16 : vector<16xf32> to vector<16x1xf32>
    %cst_12 = arith.constant 1.280000e+02 : f32
    %18 = vector.broadcast %cst_12 : f32 to vector<16x1xf32>
    %19 = arith.divf %17, %18 : vector<16x1xf32>
    %20 = vector.broadcast %19 : vector<16x1xf32> to vector<16x128xf32>
    %21 = arith.subf %15, %20 : vector<16x128xf32>
    %22 = arith.mulf %21, %21 : vector<16x128xf32>
    %cst_13 = arith.constant dense<0.000000e+00> : vector<16xf32>
    %23 = vector.multi_reduction <add>, %22, %cst_13 [1] : vector<16x128xf32> to vector<16xf32>
    %24 = vector.shape_cast %23 : vector<16xf32> to vector<16x1xf32>
    %cst_14 = arith.constant 1.280000e+02 : f32
    %25 = vector.broadcast %cst_14 : f32 to vector<16x1xf32>
    %26 = arith.divf %24, %25 : vector<16x1xf32>
    %cst_15 = arith.constant 9.99999974E-6 : f32
    %27 = vector.broadcast %cst_15 : f32 to vector<16x1xf32>
    %28 = arith.addf %26, %27 : vector<16x1xf32>
    %29 = math.rsqrt %28 : vector<16x1xf32>
    %30 = vector.broadcast %29 : vector<16x1xf32> to vector<16x128xf32>
    %31 = arith.mulf %21, %30 : vector<16x128xf32>
    %c0_16 = arith.constant 0 : index
    %c0_17 = arith.constant 0 : index
    %32 = vector.load %arg6[%c0_16, %c0_17] : memref<1x128xf32, #tpu.memory_space<vmem>>, vector<1x128xf32>
    %33 = vector.broadcast %32 : vector<1x128xf32> to vector<16x128xf32>
    %34 = arith.mulf %31, %33 : vector<16x128xf32>
    %c0_18 = arith.constant 0 : index
    %c0_19 = arith.constant 0 : index
    %35 = vector.load %arg7[%c0_18, %c0_19] : memref<1x128xf32, #tpu.memory_space<vmem>>, vector<1x128xf32>
    %36 = vector.broadcast %35 : vector<1x128xf32> to vector<16x128xf32>
    %37 = arith.addf %34, %36 : vector<16x128xf32>
    %c0_20 = arith.constant 0 : index
    %c0_21 = arith.constant 0 : index
    %38 = vector.load %arg8[%c0_20, %c0_21] : memref<16x128xf32, #tpu.memory_space<vmem>>, vector<16x128xf32>
    tpu.vector_store %arg8[%c0_20, %c0_21], %37 {strides = array<i32>} : memref<16x128xf32, #tpu.memory_space<vmem>>, vector<16x128xf32>,
    return
  }
  func.func @transform_0(%arg0: i32) -> (i32, i32) {
    %c0_i32 = arith.constant 0 : i32
    %c0_i32_0 = arith.constant 0 : i32
    return %arg0, %c0_i32 : i32, i32
  }
  func.func @transform_1(%arg0: i32) -> (i32, i32) {
    %c0_i32 = arith.constant 0 : i32
    %c0_i32_0 = arith.constant 0 : i32
    %c0_i32_1 = arith.constant 0 : i32
    return %c0_i32, %c0_i32_0 : i32, i32
  }
  func.func @transform_2(%arg0: i32) -> (i32, i32) {
    %c0_i32 = arith.constant 0 : i32
    %c0_i32_0 = arith.constant 0 : i32
    %c0_i32_1 = arith.constant 0 : i32
    return %c0_i32, %c0_i32_0 : i32, i32
  }
  func.func @transform_3(%arg0: i32) -> (i32, i32) {
    %c0_i32 = arith.constant 0 : i32
    %c0_i32_0 = arith.constant 0 : i32
    %c0_i32_1 = arith.constant 0 : i32
    return %c0_i32, %c0_i32_0 : i32, i32
  }
  func.func @transform_4(%arg0: i32) -> (i32, i32) {
    %c0_i32 = arith.constant 0 : i32
    %c0_i32_0 = arith.constant 0 : i32
    %c0_i32_1 = arith.constant 0 : i32
    return %c0_i32, %c0_i32_0 : i32, i32
  }
  func.func @transform_5(%arg0: i32) -> (i32, i32) {
    %c0_i32 = arith.constant 0 : i32
    %c0_i32_0 = arith.constant 0 : i32
    %c0_i32_1 = arith.constant 0 : i32
    return %c0_i32, %c0_i32_0 : i32, i32
  }
  func.func @transform_6(%arg0: i32) -> (i32, i32) {
    %c0_i32 = arith.constant 0 : i32
    %c0_i32_0 = arith.constant 0 : i32
    %c0_i32_1 = arith.constant 0 : i32
    return %c0_i32, %c0_i32_0 : i32, i32
  }
  func.func @transform_7(%arg0: i32) -> (i32, i32) {
    %c0_i32 = arith.constant 0 : i32
    %c0_i32_0 = arith.constant 0 : i32
    return %arg0, %c0_i32 : i32, i32
  }
}

</mosaic_0001>

<bundles_post_ra>
// kernel: tpu_custom_call.1
= control target key start
LH: loop header
LB: loop body
LE: loop exit
PB: predicated region body
PF: predicated region fallthrough
CT: control target
= control target key end

     0   :  { %12 = vsyncpa [#allocation3], 0  ;;  %s797_s0 = inlined_call_operand.hbm [shape: f32[16,128], index: 0, kind: input, shape index: {}]   ;;  %s798_s1 = inlined_call_operand.hbm [shape: bf16[128,256], index: 1, kind: input, shape index: {}]   ;;  %s799_s2 = inlined_call_operand.vmem [shape: f32[1,256], index: 2, kind: input, shape index: {}]   ;;  %s800_s3 = inlined_call_operand.hbm [shape: bf16[256,128], index: 3, kind: input, shape index: {}]   ;;  %s801_s4 = inlined_call_operand.vmem [shape: f32[1,128], index: 4, kind: input, shape index: {}]   ;;  %s802_s5 = inlined_call_operand.vmem [shape: f32[1,128], index: 5, kind: input, shape index: {}]   ;;  %s803_s6 = inlined_call_operand.vmem [shape: f32[1,128], index: 6, kind: input, shape index: {}]   ;;  %s804_s7 = inlined_call_operand.hbm [shape: f32[16,128], index: 7, kind: output, shape index: {}]  }
   0x1   :  { %13 = vsyncpa [#allocation6], 0 }
   0x2   :  { %14 = vsyncpa [#allocation4], 0  ;;  %s672_s24 = smov [#allocation5]   ;;  %s673_s26 = smov [#allocation2]  }
   0x3   :  { %s32_s25 = sshll.u32 %s672_s24, 4  ;;  %s20_s27 = sshll.u32 %s673_s26, 4  ;;  %s33_s25 = int_to_ptr.vmem [resolvable:$true] %s32_s25  ;;  %s721_s27 = int_to_ptr.vmem [resolvable:$true] %s20_s27 }
   0x4   :  { %s578_s30 = scalar_lea.hbm %s798_s1, 2048 }
   0x5   :  { %p579_p0 = scmp.ne.s32.totalorder %s798_s1, %s578_s30  ;;  %p582_p1 = scmp.lt.u32.totalorder %s578_s30, %s798_s1 }
   0x7   :  { %p584_p2 = pnand %p582_p1, %p579_p0 }
   0x9   :  { %587 = shalt.err (!%p584_p2)
}
   0xa   :  { %s588_s12 = scalar_lea.vmem %s33_s25, 2048  ;;  %p593_p4 = scmp.lt.s32.totalorder %s33_s25, %s33_s25 }
   0xb   :  { %p589_p3 = scmp.ne.s32.totalorder %s33_s25, %s588_s12  ;;  %p594_p5 = scmp.lt.s32.totalorder %s588_s12, %s588_s12 }
   0xd   :  { %p595_p6 = por %p594_p5, %p593_p4 }
   0xf   :  { %p596_p7 = pnand %p595_p6, %p589_p3 }
  0x11   :  { %599 = shalt.err (!%p596_p7)
}
  0x12   :  { %s674_s13 = smov 128   ;;  %s675_s14 = smov 8  }
  0x13   :  { %38 = dma.hbm_to_vmem [thread:$0]  %s798_s1, 2048, %s33_s25, [#allocation6], %s674_s13, %s674_s13, %s675_s14  }
  0x14   :  { %s600_s19 = scalar_lea.hbm %s797_s0, 256 }
  0x15   :  { %p601_p8 = scmp.ne.s32.totalorder %s797_s0, %s600_s19  ;;  %p604_p9 = scmp.lt.u32.totalorder %s600_s19, %s797_s0 }
  0x17   :  { %p606_p10 = pnand %p604_p9, %p601_p8 }
  0x19   :  { %609 = shalt.err (!%p606_p10)
}
  0x1a   :  { %s610_s24 = scalar_lea.vmem %s721_s27, 256  ;;  %p615_p12 = scmp.lt.s32.totalorder %s721_s27, %s721_s27 }
  0x1b   :  { %p611_p11 = scmp.ne.s32.totalorder %s721_s27, %s610_s24  ;;  %p616_p13 = scmp.lt.s32.totalorder %s610_s24, %s610_s24 }
  0x1d   :  { %p617_p0 = por %p616_p13, %p615_p12 }
  0x1f   :  { %p618_p1 = pnand %p617_p0, %p611_p11 }
  0x21   :  { %621 = shalt.err (!%p618_p1)
}
  0x22   :  { %26 = dma.hbm_to_vmem [thread:$0]  %s797_s0, 256, %s721_s27, [#allocation3], %s674_s13, %s674_s13, %s675_s14  }
  0x23   :  { %s676_s26 = smov [#allocation7]   ;;  %s622_s8 = scalar_lea.hbm %s800_s3, 2048 }
  0x24   :  { %s46_s28 = sshll.u32 %s676_s26, 4  ;;  %p623_p2 = scmp.ne.s32.totalorder %s800_s3, %s622_s8  ;;  %s47_s28 = int_to_ptr.vmem [resolvable:$true] %s46_s28 }
  0x25   :  { %p626_p3 = scmp.lt.u32.totalorder %s622_s8, %s800_s3 }
  0x27   :  { %p628_p4 = pnand %p626_p3, %p623_p2 }
  0x29   :  { %631 = shalt.err (!%p628_p4)
}
  0x2a   :  { %s632_s15 = scalar_lea.vmem %s47_s28, 2048  ;;  %p637_p6 = scmp.lt.s32.totalorder %s47_s28, %s47_s28 }
  0x2b   :  { %p633_p5 = scmp.ne.s32.totalorder %s47_s28, %s632_s15  ;;  %p638_p7 = scmp.lt.s32.totalorder %s632_s15, %s632_s15 }
  0x2d   :  { %p639_p8 = por %p638_p7, %p637_p6 }
  0x2f   :  { %p640_p9 = pnand %p639_p8, %p633_p5 }
  0x31   :  { %643 = shalt.err (!%p640_p9)
}
  0x32   :  { %s677_s0 = smov 64   ;;  %s678_s27 = smov 4  }
  0x33   :  { %52 = dma.hbm_to_vmem [thread:$0]  %s800_s3, 2048, %s47_s28, [#allocation6], %s677_s0, %s677_s0, %s678_s27  }
  0x34   :  { %666 = dma.done.wait [#allocation3], 256  }
  0x35   :  { %667 = vsyncadd [#allocation3], 4294967040 }
  0x36   :  { %668 = dma.done.wait [#allocation6], 4096  }
  0x37   :  { %669 = vsyncadd [#allocation6], 4294963200  ;;  %v679_v0 = vmov 0   ;;  %v534_v1 = vld [vmem:[#allocation5 + $0x4] ss:$8 sps:$4 sm:$0xff]   ;;  %v562_v16 = vld [vmem:[#allocation7 + $0x50] sm:$0xff]   ;;  %v90_v36 = vlaneseq }
  0x38   :  { %212 = vmatprep.mubr.bf16.mxu0 %v679_v0  ;;  %v536_v2 = vld [vmem:[#allocation5] ss:$8 sps:$4 sm:$0xff]   ;;  %180 = vmatprep.subr.bf16.mxu0 %v534_v1  ;;  %v537_v3 = vld [vmem:[#allocation5 + $0x14] ss:$8 sps:$4 sm:$0xff]   ;;  %v539_v4 = vld [vmem:[#allocation5 + $0x10] ss:$8 sps:$4 sm:$0xff]  }
  0x39   :  { %181 = vmatpush1.bf16.msra.mxu0 %v536_v2  ;;  %v540_v5 = vld [vmem:[#allocation5 + $0x24] ss:$8 sps:$4 sm:$0xff]   ;;  %v542_v6 = vld [vmem:[#allocation5 + $0x20] ss:$8 sps:$4 sm:$0xff]   ;;  %v543_v7 = vld [vmem:[#allocation5 + $0x34] ss:$8 sps:$4 sm:$0xff]  }
  0x3a   :  { %182 = vmatprep.subr.bf16.mxu0 %v537_v3  ;;  %v545_v8 = vld [vmem:[#allocation5 + $0x30] ss:$8 sps:$4 sm:$0xff]   ;;  %v546_v9 = vld [vmem:[#allocation5 + $0x44] ss:$8 sps:$4 sm:$0xff]   ;;  %v548_v11 = vld [vmem:[#allocation5 + $0x40] ss:$8 sps:$4 sm:$0xff]  }
  0x3b   :  { %v558_v10 = vld [vmem:[#allocation7 + $0x40] sm:$0xff]   ;;  %v549_v13 = vld [vmem:[#allocation5 + $0x54] ss:$8 sps:$4 sm:$0xff]   ;;  %v560_v14 = vld [vmem:[#allocation7 + $0x48] sm:$0xff]   ;;  %v91_v37 = vshrl.u32 %v90_v36, 7  ;;  %s680_s23 = smov [#allocation8]  }
  0x3c   :  { %v559_v12 = vld [vmem:[#allocation7] sm:$0xff]   ;;  %503 = vmatprep.subr.bf16.mxu1 %v558_v10  ;;  %v561_v15 = vld [vmem:[#allocation7 + $0x8] sm:$0xff]   ;;  %v551_v17 = vld [vmem:[#allocation5 + $0x50] ss:$8 sps:$4 sm:$0xff]   ;;  %s455_s24 = sshll.u32 %s680_s23, 4  ;;  %s456_s24 = int_to_ptr.vmem [resolvable:$true] %s455_s24 }
  0x3d   :  { %183 = vmatpush1.bf16.msra.mxu0 %v539_v4  ;;  %504 = vmatpush3.bf16.msra.mxu1 %v559_v12  ;;  %v552_v18 = vld [vmem:[#allocation5 + $0x64] ss:$8 sps:$4 sm:$0xff]   ;;  %v563_v19 = vld [vmem:[#allocation7 + $0x10] sm:$0xff]   ;;  %v564_v20 = vld [vmem:[#allocation7 + $0x58] sm:$0xff]   ;;  %v92_v38 = vsub.s32 0, %v91_v37  ;;  %v96_v40 = vsub.s32 1, %v91_v37  ;;  %p649_p11 = scmp.lt.s32.totalorder %s456_s24, %s456_s24 }
  0x3e   :  { %184 = vmatprep.subr.bf16.mxu0 %v540_v5  ;;  %505 = vmatprep.subr.bf16.mxu1 %v560_v14  ;;  %v554_v21 = vld [vmem:[#allocation5 + $0x60] ss:$8 sps:$4 sm:$0xff]   ;;  %v555_v22 = vld [vmem:[#allocation5 + $0x74] ss:$8 sps:$4 sm:$0xff]   ;;  %v557_v25 = vld [vmem:[#allocation5 + $0x70] ss:$8 sps:$4 sm:$0xff]  }
  0x3f   :  { %v565_v23 = vld [vmem:[#allocation7 + $0x18] sm:$0xff]   ;;  %v566_v24 = vld [vmem:[#allocation7 + $0x60] sm:$0xff]   ;;  %v69_v26 = vld [vmem:[#allocation2] sm:$0xff]  ;;  %s644_s1 = scalar_lea.vmem %s456_s24, 256 }
  0x40   :  { %v70_v27 = vld [vmem:[#allocation2 + $0x8] sm:$0xff]  ;;  %v567_v28 = vld [vmem:[#allocation7 + $0x20] sm:$0xff]   ;;  %v568_v29 = vld [vmem:[#allocation7 + $0x68] sm:$0xff]   ;;  %p645_p10 = scmp.ne.s32.totalorder %s456_s24, %s644_s1  ;;  %p650_p12 = scmp.lt.s32.totalorder %s644_s1, %s644_s1 }
  0x41   :  { %185 = vmatpush1.bf16.msra.mxu0 %v542_v6  ;;  %506 = vmatpush3.bf16.msra.mxu1 %v561_v15  ;;  %v71_v30 = vpack.c.bf16 %v70_v27, %v69_v26  ;;  %v569_v31 = vld [vmem:[#allocation7 + $0x28] sm:$0xff]   ;;  %v570_v32 = vld [vmem:[#allocation7 + $0x70] sm:$0xff]   ;;  %v572_v34 = vld [vmem:[#allocation7 + $0x78] sm:$0xff]  }
  0x42   :  { %186 = vmatprep.subr.bf16.mxu0 %v543_v7  ;;  %507 = vmatprep.subr.bf16.mxu1 %v562_v16  ;;  %v571_v33 = vld [vmem:[#allocation7 + $0x30] sm:$0xff]   ;;  %v573_v35 = vld [vmem:[#allocation7 + $0x38] sm:$0xff]   ;;  %p651_p13 = por %p650_p12, %p649_p11 }
  0x43   :  { %v88_v39 = vld [vmem:[%s799_s2] sm:$0x3] }
  0x44   :  { %v93_v41 = vrot.slane %v88_v39, %v92_v38  ;;  %v97_v42 = vrot.slane %v88_v39, %v96_v40  ;;  %v484_v58 = vld [vmem:[%s801_s4] ss:$0 sm:$0xff]  ;;  %p652_p0 = pnand %p651_p13, %p645_p10 }
  0x45   :  { %187 = vmatpush1.bf16.msra.mxu0 %v545_v8  ;;  %508 = vmatpush3.bf16.msra.mxu1 %v563_v19  ;;  %v501_v19 = vld [vmem:[%s802_s5] ss:$0 sm:$0xff] }
  0x46   :  { %188 = vmatprep.subr.bf16.mxu0 %v546_v9  ;;  %509 = vmatprep.subr.bf16.mxu1 %v564_v20 }
  0x49   :  { %189 = vmatpush1.bf16.msra.mxu0 %v548_v11  ;;  %510 = vmatpush3.bf16.msra.mxu1 %v565_v23 }
  0x4a   :  { %190 = vmatprep.subr.bf16.mxu0 %v549_v13  ;;  %511 = vmatprep.subr.bf16.mxu1 %v566_v24 }
  0x4d   :  { %191 = vmatpush1.bf16.msra.mxu0 %v551_v17  ;;  %512 = vmatpush3.bf16.msra.mxu1 %v567_v28 }
  0x4e   :  { %192 = vmatprep.subr.bf16.mxu0 %v552_v18  ;;  %513 = vmatprep.subr.bf16.mxu1 %v568_v29 }
  0x51   :  { %193 = vmatpush1.bf16.msra.mxu0 %v554_v21  ;;  %514 = vmatpush3.bf16.msra.mxu1 %v569_v31  ;;  %v502_v21 = vld [vmem:[%s803_s6] ss:$0 sm:$0xff] }
  0x52   :  { %194 = vmatprep.subr.bf16.mxu0 %v555_v22  ;;  %515 = vmatprep.subr.bf16.mxu1 %v570_v32 }
  0x55   :  { %195 = vmatpush1.bf16.msra.mxu0 %v557_v25  ;;  %516 = vmatpush3.bf16.msra.mxu1 %v571_v33 }
  0x56   :  { %517 = vmatprep.subr.bf16.mxu1 %v572_v34 }
  0x58   :  { %213 = vmatmul.mubr.bf16.vlgmr.msra.gmra.mrb[0].mxu0 %v71_v30 }
  0x59   :  { %518 = vmatpush3.bf16.msra.mxu1 %v573_v35 }
 0x12b   :  { %v214_v43 = vpop.f32.mrb[0].mxu0 }
 0x12c   :  { %v215_v44 = vadd.f32 %v214_v43, %v93_v41  ;;  %v216_v45 = vpop.f32.mrb[1].mxu0 }
 0x12d   :  { %v217_v46 = vadd.f32 %v216_v45, %v97_v42  ;;  %v218_v47 = vpop.f32.mrb[2].mxu0 }
 0x12e   :  { %v219_v48 = vadd.f32 %v218_v47, %v93_v41  ;;  %v220_v49 = vpop.f32.mrb[3].mxu0  ;;  %v223_v51 = vmax.f32 %v215_v44, 0.0 }
 0x12f   :  { %v221_v50 = vadd.f32 %v220_v49, %v97_v42  ;;  %v224_v53 = vmax.f32 %v217_v46, 0.0 }
 0x130   :  { %v225_v52 = vmax.f32 %v219_v48, 0.0 }
 0x131   :  { %v226_v54 = vmax.f32 %v221_v50, 0.0 }
 0x132   :  { %v227_v55 = vpack.c.bf16 %v225_v52, %v223_v51 }
 0x133   :  { %v228_v56 = vpack.c.bf16 %v226_v54, %v224_v53 }
 0x135   :  { %396 = vmatprep.mubr.bf16.mxu1 %v228_v56 }
 0x136   :  { %397 = vmatmul.mubr.bf16.vlgmr.msra.gmra.mrb[0].mxu1 %v227_v55 }
 0x209   :  { %v519_v57 = vpop.f32.mrb[0].mxu1 }
 0x20a   :  { %v520_v59 = vpop.f32.mrb[1].mxu1 }
 0x20b   :  { %v521_v60 = vadd.f32 %v520_v59, %v519_v57  ;;  %v522_v61 = vpop.f32.mrb[2].mxu1 }
 0x20c   :  { %v523_v62 = vpop.f32.mrb[3].mxu1 }
 0x20d   :  { %v399_v63 = vadd.f32 %v521_v60, %v484_v58  ;;  %v524_v0 = vadd.f32 %v523_v62, %v522_v61 }
 0x20f   :  { %v402_v1 = vadd.f32 %v524_v0, %v484_v58  ;;  %v405_v2 = vadd.f32 %v399_v63, %v69_v26 }
 0x211   :  { %407 = vadd.xlane.f32.xlu0 %v405_v2  ;;  %v406_v3 = vadd.f32 %v402_v1, %v70_v27 }
 0x215   :  { %409 = vadd.xlane.f32.xlu0 %v406_v3 }
 0x29e   :  { %v408_v4 = vpop.xlane.xlu0 %407 }
 0x29f   :  { %v412_v5 = vmul.f32 0.0078125, %v408_v4 }
 0x2a1   :  { %v414_v6 = vsub.f32 %v405_v2, %v412_v5 }
 0x2a2   :  { %v410_v7 = vpop.xlane.xlu0 %409 }
 0x2a3   :  { %v413_v8 = vmul.f32 0.0078125, %v410_v7  ;;  %v416_v9 = vmul.f32 %v414_v6, %v414_v6 }
 0x2a5   :  { %v415_v10 = vsub.f32 %v406_v3, %v413_v8  ;;  %418 = vadd.xlane.f32.xlu1 %v416_v9 }
 0x2a7   :  { %v417_v11 = vmul.f32 %v415_v10, %v415_v10 }
 0x2a9   :  { %420 = vadd.xlane.f32.xlu1 %v417_v11 }
 0x332   :  { %v419_v12 = vpop.xlane.xlu1 %418 }
 0x333   :  { %v422_v13 = vmul.f32 0.0078125, %v419_v12 }
 0x335   :  { %v424_v14 = vadd.f32 1e-05, %v422_v13 }
 0x336   :  { %v421_v15 = vpop.xlane.xlu1 %420 }
 0x337   :  { %574 = vrsqrt.f32 %v424_v14  ;;  %v423_v16 = vmul.f32 0.0078125, %v421_v15 }
 0x339   :  { %v425_v17 = vadd.f32 1e-05, %v423_v16 }
 0x33b   :  { %576 = vrsqrt.f32 %v425_v17 }
 0x341   :  { %v575_v18 = vpop.eup %574 }
 0x342   :  { %v428_v20 = vmul.f32 %v575_v18, %v414_v6 }
 0x344   :  { %v437_v22 = vmul.f32 %v501_v19, %v428_v20 }
 0x345   :  { %v577_v23 = vpop.eup %576 }
 0x346   :  { %v429_v24 = vmul.f32 %v577_v23, %v415_v10  ;;  %v446_v25 = vadd.f32 %v502_v21, %v437_v22 }
 0x348   :  { %v438_v26 = vmul.f32 %v501_v19, %v429_v24  ;;  %448 = vst [vmem:[#allocation8] sm:$0xff] %v446_v25 }
 0x34a   :  { %v447_v27 = vadd.f32 %v502_v21, %v438_v26 }
 0x34c   :  { %449 = vst [vmem:[#allocation8 + $0x8] sm:$0xff] %v447_v27 }
 0x34d   :  { %655 = shalt.err (!%p652_p0)
}
 0x34e   :  { %s656_s25 = scalar_lea.hbm %s804_s7, 256 }
 0x34f   :  { %p657_p1 = scmp.ne.s32.totalorder %s804_s7, %s656_s25  ;;  %p660_p2 = scmp.lt.u32.totalorder %s656_s25, %s804_s7 }
 0x351   :  { %p662_p3 = pnand %p660_p2, %p657_p1 }
 0x353   :  { %665 = shalt.err (!%p662_p3)
}
 0x354   :  { %461 = dma.vmem_to_hbm [thread:$0]  %s456_s24, 256, %s804_s7, [#allocation4], %s674_s13, %s674_s13, %s675_s14  }
 0x355   :  { %670 = dma.done.wait [#allocation4], 256  }
 0x356   :  { %671 = vsyncadd [#allocation4], 4294967040 }
 0x357   :  { %465 = vsyncpa [#allocation3], 1 }
 0x358   :  { %466 = vsyncpa [#allocation6], 1 }
 0x359   :  { %467 = vsyncpa [#allocation4], 1 }

</bundles_post_ra>
